<compile_context>
chip_gen: v7x
topology: tpu7x:2x2x1
jax: 0.10.0
libtpu: 0.0.40
codegen_flags: <defaults>
</compile_context>

<pallas_src>
import functools
import math

import jax
import jax.numpy as jnp
from jax import lax
from jax.experimental import pallas as pl
from jax.experimental.pallas import tpu as pltpu

LN_EPS = 1e-6      # onmt LayerNorm eps
NEG_INF = -1e18    # onmt masked_fill value


# ------------------------------ helpers ------------------------------------ #

def _pick_tile(dim, target, align):
    """Largest multiple of `align` dividing `dim` that is <= target; else full dim."""
    if dim <= target:
        return dim
    t = (target // align) * align
    while t >= align:
        if dim % t == 0:
            return t
        t -= align
    return dim


def _layernorm_f32(x, g, b):
    # onmt LayerNorm: (x - mean) / (std_unbiased + eps) * a_2 + b_2   (stats in f32)
    d = x.shape[-1]
    mu = jnp.mean(x, axis=-1, keepdims=True)
    var = jnp.sum((x - mu) ** 2, axis=-1, keepdims=True) / (d - 1)
    y = (x - mu) / (jnp.sqrt(var) + LN_EPS)
    return y * g + b


# ------------------------------ kernels ------------------------------------ #

def _attn_block_kernel(x_ref, m_ref, g_ref, b_ref, wqkv_ref, bqkv_ref,
                       wo_ref, bo_ref, o_ref, *, heads):
    # One batch per grid step. Everything from LN1 through the residual add is
    # computed in VMEM; no intermediate hits HBM.
    # TODO(synk): for long sequences switch to a flash-style KV-tiled online softmax
    # instead of materializing the full [S, S] score tile (v7x 64 MiB VMEM).
    x = x_ref[0].astype(jnp.float32)               # [S, D]
    mask = m_ref[0]                                # [1, S]; 1.0 == padded / masked
    D = x.shape[-1]
    dh = D // heads

    # LN1 + fused QKV projection (attention scale already folded into Wq/bq).
    y = _layernorm_f32(x, g_ref[...], b_ref[...])
    qkv = jnp.dot(y, wqkv_ref[...],
                  preferred_element_type=jnp.float32) + bqkv_ref[...]   # [S, 3D]

    q_all = qkv[:, 0:D]                            # Q already scaled by 1/sqrt(dh)
    k_all = qkv[:, D:2 * D]
    v_all = qkv[:, 2 * D:3 * D]

    ctx_parts = []
    for h in range(heads):                         # static unrolled loop over heads
        lo, hi = h * dh, (h + 1) * dh
        q = q_all[:, lo:hi]
        k = k_all[:, lo:hi]
        v = v_all[:, lo:hi]
        # contract last axes directly on the MXU (no k.T materialization)
        scores = lax.dot_general(q, k, (((1,), (1,)), ((), ())),
                                 preferred_element_type=jnp.float32)    # [S, S]
        scores = jnp.where(mask > 0.5, NEG_INF, scores)
        m = jnp.max(scores, axis=-1, keepdims=True)
        p = jnp.exp(scores - m)
        denom = jnp.sum(p, axis=-1, keepdims=True)
        pv = jnp.dot(p, v, preferred_element_type=jnp.float32)          # [S, dh]
        # normalize after PV: divide on [S, dh] instead of [S, S]
        ctx_parts.append(pv * pl.reciprocal(denom))
    ctx = jnp.concatenate(ctx_parts, axis=-1)      # [S, D], lane-dense

    # Output projection + residual, fused into the same kernel.
    out = (jnp.dot(ctx, wo_ref[...], preferred_element_type=jnp.float32)
           + bo_ref[...] + x)
    o_ref[0] = out.astype(o_ref.dtype)


def _ffn_kernel(x_ref, g_ref, b_ref, w1_ref, b1_ref, w2_ref, b2_ref, o_ref):
    # LN2 -> W1 -> ReLU -> W2 -> +residual; hidden activation stays in VMEM.
    x = x_ref[...].astype(jnp.float32)
    y = _layernorm_f32(x, g_ref[...], b_ref[...])
    h = jnp.dot(y, w1_ref[...], preferred_element_type=jnp.float32) + b1_ref[...]
    h = jnp.maximum(h, 0.0)
    o = jnp.dot(h, w2_ref[...], preferred_element_type=jnp.float32) + b2_ref[...] + x
    o_ref[...] = o.astype(o_ref.dtype)


# ------------------------------ wrappers ------------------------------------ #

def attn_block(x, mask, g, b, wqkv, bqkv, wo, bo, heads):
    # x: [B, S, D]; mask: [B, 1, S] float (1.0 = masked). Output: [B, S, D].
    B, S, D = x.shape
    return pl.pallas_call(
        functools.partial(_attn_block_kernel, heads=heads),
        out_shape=jax.ShapeDtypeStruct((B, S, D), x.dtype),
        grid=(B,),
        in_specs=[pl.BlockSpec((1, S, D), lambda i: (i, 0, 0)),
                  pl.BlockSpec((1, 1, S), lambda i: (i, 0, 0)),
                  pl.BlockSpec((1, D), lambda i: (0, 0)),        # ln1 gamma (resident)
                  pl.BlockSpec((1, D), lambda i: (0, 0)),        # ln1 beta  (resident)
                  pl.BlockSpec((D, 3 * D), lambda i: (0, 0)),    # fused Wqkv (resident)
                  pl.BlockSpec((1, 3 * D), lambda i: (0, 0)),    # fused bqkv (resident)
                  pl.BlockSpec((D, D), lambda i: (0, 0)),        # Wo (resident)
                  pl.BlockSpec((1, D), lambda i: (0, 0))],       # bo (resident)
        out_specs=pl.BlockSpec((1, S, D), lambda i: (i, 0, 0)),
        compiler_params=pltpu.CompilerParams(dimension_semantics=("parallel",)),
    )(x, mask, g, b, wqkv, bqkv, wo, bo)


def ffn_fused(x2d, g, b, w1, b1, w2, b2, *, tm_target=256):
    M, D = x2d.shape
    Dw, Hid = w1.shape
    assert D == Dw
    tm = _pick_tile(M, tm_target, 8)
    return pl.pallas_call(
        _ffn_kernel,
        out_shape=jax.ShapeDtypeStruct((M, D), x2d.dtype),
        grid=(pl.cdiv(M, tm),),
        in_specs=[pl.BlockSpec((tm, D), lambda i: (i, 0)),
                  pl.BlockSpec((1, D), lambda i: (0, 0)),
                  pl.BlockSpec((1, D), lambda i: (0, 0)),
                  pl.BlockSpec((D, Hid), lambda i: (0, 0)),
                  pl.BlockSpec((1, Hid), lambda i: (0, 0)),
                  pl.BlockSpec((Hid, D), lambda i: (0, 0)),
                  pl.BlockSpec((1, D), lambda i: (0, 0))],
        out_specs=pl.BlockSpec((tm, D), lambda i: (i, 0)),
        compiler_params=pltpu.CompilerParams(dimension_semantics=("parallel",)),
    )(x2d, g, b, w1, b1, w2, b2)


# ------------------------ full encoder-layer forward ------------------------ #

def fuse_params(params):
    """One-time parameter prep: fuse QKV weights, fold 1/sqrt(dh) into Wq/bq."""
    heads = params["heads"]
    d_model = params["wq"].shape[0]
    dh = d_model // heads
    scale = 1.0 / math.sqrt(dh)
    fp = dict(params)
    fp["wqkv"] = jnp.concatenate(
        [params["wq"] * scale, params["wk"], params["wv"]], axis=1)   # [D, 3D]
    fp["bqkv"] = jnp.concatenate(
        [params["bq"] * scale, params["bk"], params["bv"]], axis=1)   # [1, 3D]
    return fp


def transformer_encoder_layer(fparams, inputs, mask):
    B, S, D = inputs.shape
    H = fparams["heads"]

    # Fused attention block: LN1 + QKV + MHA + out-proj + residual.
    # TODO(synk): dropout layers are identity here (inference/eval mode).
    out = attn_block(inputs, mask,
                     fparams["ln1_g"], fparams["ln1_b"],
                     fparams["wqkv"], fparams["bqkv"],
                     fparams["wo"], fparams["bo"], H)                 # [B, S, D]

    # Fused PositionwiseFeedForward (LN2 -> W1 -> ReLU -> W2 -> +out), row-tiled.
    out2d = out.reshape(B * S, D)
    result = ffn_fused(out2d, fparams["ln2_g"], fparams["ln2_b"],
                       fparams["w1"], fparams["b1"],
                       fparams["w2"], fparams["b2"])                  # [B*S, D]
    return result.reshape(B, S, D)


# ------------------------- pure-JAX reference ------------------------------ #

def reference_forward(params, inputs, mask):
    B, S, D = inputs.shape
    H = params["heads"]
    dh = D // H

    def ln(x, g, b):
        mu = jnp.mean(x, -1, keepdims=True)
        var = jnp.sum((x - mu) ** 2, -1, keepdims=True) / (x.shape[-1] - 1)
        return (x - mu) / (jnp.sqrt(var) + LN_EPS) * g + b

    xn = ln(inputs, params["ln1_g"], params["ln1_b"])
    q = xn @ params["wq"] + params["bq"]
    k = xn @ params["wk"] + params["bk"]
    v = xn @ params["wv"] + params["bv"]

    def to_heads(t):
        return t.reshape(B, S, H, dh).transpose(0, 2, 1, 3)

    qh = to_heads(q) / math.sqrt(dh)
    kh, vh = to_heads(k), to_heads(v)
    scores = jnp.einsum("bhqd,bhkd->bhqk", qh, kh)
    scores = jnp.where(mask[:, None, :, :] > 0.5, NEG_INF, scores)
    attn = jax.nn.softmax(scores, axis=-1)
    ctx = jnp.einsum("bhqk,bhkd->bhqd", attn, vh)
    ctx = ctx.transpose(0, 2, 1, 3).reshape(B, S, D)
    attn_out = ctx @ params["wo"] + params["bo"]
    out = attn_out + inputs

    ffn_in = ln(out, params["ln2_g"], params["ln2_b"])
    h1 = jnp.maximum(ffn_in @ params["w1"] + params["b1"], 0.0)
    h2 = h1 @ params["w2"] + params["b2"]
    return h2 + out


# -------------------------------- main ------------------------------------- #

def init_params(key, d_model, heads, hidden):
    ks = jax.random.split(key, 8)

    def w(k, shape):
        return jax.random.normal(k, shape, jnp.float32) * 0.02

    return {
        "heads": heads,
        "ln1_g": jnp.ones((1, d_model), jnp.float32),
        "ln1_b": jnp.zeros((1, d_model), jnp.float32),
        "wq": w(ks[0], (d_model, d_model)), "bq": jnp.zeros((1, d_model), jnp.float32),
        "wk": w(ks[1], (d_model, d_model)), "bk": jnp.zeros((1, d_model), jnp.float32),
        "wv": w(ks[2], (d_model, d_model)), "bv": jnp.zeros((1, d_model), jnp.float32),
        "wo": w(ks[3], (d_model, d_model)), "bo": jnp.zeros((1, d_model), jnp.float32),
        "ln2_g": jnp.ones((1, d_model), jnp.float32),
        "ln2_b": jnp.zeros((1, d_model), jnp.float32),
        "w1": w(ks[4], (d_model, hidden)), "b1": jnp.zeros((1, hidden), jnp.float32),
        "w2": w(ks[5], (hidden, d_model)), "b2": jnp.zeros((1, d_model), jnp.float32),
    }


if __name__ == "__main__":
    B, S, D, H, HIDDEN = 2, 8, 32, 4, 64

    key = jax.random.PRNGKey(0)
    k_in, k_par = jax.random.split(key)
    params = init_params(k_par, D, H, HIDDEN)
    fparams = fuse_params(params)

    inputs = jax.random.normal(k_in, (B, S, D), jnp.float32)
    # padding mask [B, 1, S]: 1.0 = masked (pad). batch 0 full length, batch 1
    # has the last 2 positions padded.
    lengths = jnp.array([S, S - 2], jnp.int32)
    mask = (jnp.arange(S)[None, None, :] >= lengths[:, None, None]).astype(jnp.float32)

    out = transformer_encoder_layer(fparams, inputs, mask)
    out = jax.block_until_ready(out)

    ref = reference_forward(params, inputs, mask)
    assert out.shape == (B, S, D)
    assert jnp.allclose(out, ref, atol=1e-4, rtol=1e-4), "mismatch vs reference"

    print("KERNEL_OK")
</pallas_src>

<mosaic_0001>
module attributes {stable_mosaic.version = 11 : i64} {
  func.func @_attn_block_kernel(%arg0: i32, %arg1: memref<1x8x32xf32, #tpu.memory_space<vmem>>, %arg2: memref<1x1x8xf32, #tpu.memory_space<vmem>>, %arg3: memref<1x32xf32, #tpu.memory_space<vmem>>, %arg4: memref<1x32xf32, #tpu.memory_space<vmem>>, %arg5: memref<32x96xf32, #tpu.memory_space<vmem>>, %arg6: memref<1x96xf32, #tpu.memory_space<vmem>>, %arg7: memref<32x32xf32, #tpu.memory_space<vmem>>, %arg8: memref<1x32xf32, #tpu.memory_space<vmem>>, %arg9: memref<1x8x32xf32, #tpu.memory_space<vmem>>) attributes {dimension_semantics = [#tpu.dimension_semantics<parallel>], iteration_bounds = array<i64: 2>, scalar_prefetch = 0 : i64, scratch_operands = 0 : i64, tpu.core_type = #tpu.core_type<tc>, window_params = [{transform_indices = @transform_0, window_bounds = array<i64: 1, 8, 32>}, {transform_indices = @transform_1, window_bounds = array<i64: 1, 1, 8>}, {pipeline_mode = #tpu.pipeline_mode<synchronous>, transform_indices = @transform_2, window_bounds = array<i64: 1, 32>}, {pipeline_mode = #tpu.pipeline_mode<synchronous>, transform_indices = @transform_3, window_bounds = array<i64: 1, 32>}, {pipeline_mode = #tpu.pipeline_mode<synchronous>, transform_indices = @transform_4, window_bounds = array<i64: 32, 96>}, {pipeline_mode = #tpu.pipeline_mode<synchronous>, transform_indices = @transform_5, window_bounds = array<i64: 1, 96>}, {pipeline_mode = #tpu.pipeline_mode<synchronous>, transform_indices = @transform_6, window_bounds = array<i64: 32, 32>}, {pipeline_mode = #tpu.pipeline_mode<synchronous>, transform_indices = @transform_7, window_bounds = array<i64: 1, 32>}, {transform_indices = @transform_8, window_bounds = array<i64: 1, 8, 32>}]} {
    %c0 = arith.constant 0 : index
    %c0_0 = arith.constant 0 : index
    %c0_1 = arith.constant 0 : index
    %0 = vector.load %arg1[%c0, %c0_0, %c0_1] : memref<1x8x32xf32, #tpu.memory_space<vmem>>, vector<1x8x32xf32>
    %1 = vector.shape_cast %0 : vector<1x8x32xf32> to vector<8x32xf32>
    %c0_2 = arith.constant 0 : index
    %c0_3 = arith.constant 0 : index
    %c0_4 = arith.constant 0 : index
    %2 = vector.load %arg2[%c0_2, %c0_3, %c0_4] : memref<1x1x8xf32, #tpu.memory_space<vmem>>, vector<1x1x8xf32>
    %3 = vector.shape_cast %2 : vector<1x1x8xf32> to vector<1x8xf32>
    %c0_5 = arith.constant 0 : index
    %c0_6 = arith.constant 0 : index
    %4 = vector.load %arg3[%c0_5, %c0_6] : memref<1x32xf32, #tpu.memory_space<vmem>>, vector<1x32xf32>
    %c0_7 = arith.constant 0 : index
    %c0_8 = arith.constant 0 : index
    %5 = vector.load %arg4[%c0_7, %c0_8] : memref<1x32xf32, #tpu.memory_space<vmem>>, vector<1x32xf32>
    %cst = arith.constant dense<0.000000e+00> : vector<8xf32>
    %6 = vector.multi_reduction <add>, %1, %cst [1] : vector<8x32xf32> to vector<8xf32>
    %7 = vector.shape_cast %6 : vector<8xf32> to vector<8x1xf32>
    %cst_9 = arith.constant 3.200000e+01 : f32
    %8 = vector.broadcast %cst_9 : f32 to vector<8x1xf32>
    %9 = arith.divf %7, %8 : vector<8x1xf32>
    %10 = vector.broadcast %9 : vector<8x1xf32> to vector<8x32xf32>
    %11 = arith.subf %1, %10 : vector<8x32xf32>
    %12 = arith.mulf %11, %11 : vector<8x32xf32>
    %cst_10 = arith.constant dense<0.000000e+00> : vector<8xf32>
    %13 = vector.multi_reduction <add>, %12, %cst_10 [1] : vector<8x32xf32> to vector<8xf32>
    %14 = vector.shape_cast %13 : vector<8xf32> to vector<8x1xf32>
    %cst_11 = arith.constant 3.100000e+01 : f32
    %15 = vector.broadcast %cst_11 : f32 to vector<8x1xf32>
    %16 = arith.divf %14, %15 : vector<8x1xf32>
    %17 = vector.broadcast %9 : vector<8x1xf32> to vector<8x32xf32>
    %18 = arith.subf %1, %17 : vector<8x32xf32>
    %19 = math.sqrt %16 : vector<8x1xf32>
    %cst_12 = arith.constant 9.99999997E-7 : f32
    %20 = vector.broadcast %cst_12 : f32 to vector<8x1xf32>
    %21 = arith.addf %19, %20 : vector<8x1xf32>
    %22 = vector.broadcast %21 : vector<8x1xf32> to vector<8x32xf32>
    %23 = arith.divf %18, %22 : vector<8x32xf32>
    %24 = vector.broadcast %4 : vector<1x32xf32> to vector<8x32xf32>
    %25 = arith.mulf %23, %24 : vector<8x32xf32>
    %26 = vector.broadcast %5 : vector<1x32xf32> to vector<8x32xf32>
    %27 = arith.addf %25, %26 : vector<8x32xf32>
    %c0_13 = arith.constant 0 : index
    %c0_14 = arith.constant 0 : index
    %28 = vector.load %arg5[%c0_13, %c0_14] : memref<32x96xf32, #tpu.memory_space<vmem>>, vector<32x96xf32>
    %cst_15 = arith.constant dense<0.000000e+00> : vector<8x96xf32>
    %29 = tpu.matmul %27, %28, %cst_15 {dimension_numbers = #tpu.dot_dimension_numbers<[1], [0], [0], [1], [0, 0, 1, 1], [], []>} : vector<8x32xf32>, vector<32x96xf32>, vector<8x96xf32> -> vector<8x96xf32>
    %c0_16 = arith.constant 0 : index
    %c0_17 = arith.constant 0 : index
    %30 = vector.load %arg6[%c0_16, %c0_17] : memref<1x96xf32, #tpu.memory_space<vmem>>, vector<1x96xf32>
    %31 = vector.broadcast %30 : vector<1x96xf32> to vector<8x96xf32>
    %32 = arith.addf %29, %31 : vector<8x96xf32>
    %33 = vector.extract_strided_slice %32 {offsets = [0, 0], sizes = [8, 32], strides = [1, 1]} : vector<8x96xf32> to vector<8x32xf32>
    %34 = vector.extract_strided_slice %32 {offsets = [0, 32], sizes = [8, 32], strides = [1, 1]} : vector<8x96xf32> to vector<8x32xf32>
    %35 = vector.extract_strided_slice %32 {offsets = [0, 64], sizes = [8, 32], strides = [1, 1]} : vector<8x96xf32> to vector<8x32xf32>
    %36 = vector.extract_strided_slice %33 {offsets = [0, 0], sizes = [8, 8], strides = [1, 1]} : vector<8x32xf32> to vector<8x8xf32>
    %37 = vector.extract_strided_slice %34 {offsets = [0, 0], sizes = [8, 8], strides = [1, 1]} : vector<8x32xf32> to vector<8x8xf32>
    %38 = vector.extract_strided_slice %35 {offsets = [0, 0], sizes = [8, 8], strides = [1, 1]} : vector<8x32xf32> to vector<8x8xf32>
    %cst_18 = arith.constant dense<0.000000e+00> : vector<8x8xf32>
    %39 = tpu.matmul %36, %37, %cst_18 {dimension_numbers = #tpu.dot_dimension_numbers<[1], [1], [0], [0], [0, 0, 1, 0], [], []>} : vector<8x8xf32>, vector<8x8xf32>, vector<8x8xf32> -> vector<8x8xf32>
    %cst_19 = arith.constant 5.000000e-01 : f32
    %40 = vector.broadcast %cst_19 : f32 to vector<1x8xf32>
    %41 = arith.cmpf ogt, %3, %40 : vector<1x8xf32>
    %cst_20 = arith.constant -9.99999984E+17 : f32
    %42 = vector.shape_cast %41 : vector<1x8xi1> to vector<1x8xi1>
    %43 = vector.broadcast %42 : vector<1x8xi1> to vector<8x8xi1>
    %44 = vector.broadcast %cst_20 : f32 to vector<8x8xf32>
    %45 = arith.select %43, %44, %39 : vector<8x8xi1>, vector<8x8xf32>
    %cst_21 = arith.constant dense<0xFF800000> : vector<8xf32>
    %46 = vector.multi_reduction <maximumf>, %45, %cst_21 [1] : vector<8x8xf32> to vector<8xf32>
    %47 = vector.shape_cast %46 : vector<8xf32> to vector<8x1xf32>
    %48 = vector.broadcast %47 : vector<8x1xf32> to vector<8x8xf32>
    %49 = arith.subf %45, %48 : vector<8x8xf32>
    %50 = math.exp %49 : vector<8x8xf32>
    %cst_22 = arith.constant dense<0.000000e+00> : vector<8xf32>
    %51 = vector.multi_reduction <add>, %50, %cst_22 [1] : vector<8x8xf32> to vector<8xf32>
    %52 = vector.shape_cast %51 : vector<8xf32> to vector<8x1xf32>
    %cst_23 = arith.constant dense<0.000000e+00> : vector<8x8xf32>
    %53 = tpu.matmul %50, %38, %cst_23 {dimension_numbers = #tpu.dot_dimension_numbers<[1], [0], [0], [1], [0, 0, 1, 1], [], []>} : vector<8x8xf32>, vector<8x8xf32>, vector<8x8xf32> -> vector<8x8xf32>
    %54 = tpu.reciprocal %52 : vector<8x1xf32> -> vector<8x1xf32>
    %55 = vector.broadcast %54 : vector<8x1xf32> to vector<8x8xf32>
    %56 = arith.mulf %53, %55 : vector<8x8xf32>
    %57 = vector.extract_strided_slice %33 {offsets = [0, 8], sizes = [8, 8], strides = [1, 1]} : vector<8x32xf32> to vector<8x8xf32>
    %58 = vector.extract_strided_slice %34 {offsets = [0, 8], sizes = [8, 8], strides = [1, 1]} : vector<8x32xf32> to vector<8x8xf32>
    %59 = vector.extract_strided_slice %35 {offsets = [0, 8], sizes = [8, 8], strides = [1, 1]} : vector<8x32xf32> to vector<8x8xf32>
    %cst_24 = arith.constant dense<0.000000e+00> : vector<8x8xf32>
    %60 = tpu.matmul %57, %58, %cst_24 {dimension_numbers = #tpu.dot_dimension_numbers<[1], [1], [0], [0], [0, 0, 1, 0], [], []>} : vector<8x8xf32>, vector<8x8xf32>, vector<8x8xf32> -> vector<8x8xf32>
    %cst_25 = arith.constant 5.000000e-01 : f32
    %61 = vector.broadcast %cst_25 : f32 to vector<1x8xf32>
    %62 = arith.cmpf ogt, %3, %61 : vector<1x8xf32>
    %cst_26 = arith.constant -9.99999984E+17 : f32
    %63 = vector.shape_cast %62 : vector<1x8xi1> to vector<1x8xi1>
    %64 = vector.broadcast %63 : vector<1x8xi1> to vector<8x8xi1>
    %65 = vector.broadcast %cst_26 : f32 to vector<8x8xf32>
    %66 = arith.select %64, %65, %60 : vector<8x8xi1>, vector<8x8xf32>
    %cst_27 = arith.constant dense<0xFF800000> : vector<8xf32>
    %67 = vector.multi_reduction <maximumf>, %66, %cst_27 [1] : vector<8x8xf32> to vector<8xf32>
    %68 = vector.shape_cast %67 : vector<8xf32> to vector<8x1xf32>
    %69 = vector.broadcast %68 : vector<8x1xf32> to vector<8x8xf32>
    %70 = arith.subf %66, %69 : vector<8x8xf32>
    %71 = math.exp %70 : vector<8x8xf32>
    %cst_28 = arith.constant dense<0.000000e+00> : vector<8xf32>
    %72 = vector.multi_reduction <add>, %71, %cst_28 [1] : vector<8x8xf32> to vector<8xf32>
    %73 = vector.shape_cast %72 : vector<8xf32> to vector<8x1xf32>
    %cst_29 = arith.constant dense<0.000000e+00> : vector<8x8xf32>
    %74 = tpu.matmul %71, %59, %cst_29 {dimension_numbers = #tpu.dot_dimension_numbers<[1], [0], [0], [1], [0, 0, 1, 1], [], []>} : vector<8x8xf32>, vector<8x8xf32>, vector<8x8xf32> -> vector<8x8xf32>
    %75 = tpu.reciprocal %73 : vector<8x1xf32> -> vector<8x1xf32>
    %76 = vector.broadcast %75 : vector<8x1xf32> to vector<8x8xf32>
    %77 = arith.mulf %74, %76 : vector<8x8xf32>
    %78 = vector.extract_strided_slice %33 {offsets = [0, 16], sizes = [8, 8], strides = [1, 1]} : vector<8x32xf32> to vector<8x8xf32>
    %79 = vector.extract_strided_slice %34 {offsets = [0, 16], sizes = [8, 8], strides = [1, 1]} : vector<8x32xf32> to vector<8x8xf32>
    %80 = vector.extract_strided_slice %35 {offsets = [0, 16], sizes = [8, 8], strides = [1, 1]} : vector<8x32xf32> to vector<8x8xf32>
    %cst_30 = arith.constant dense<0.000000e+00> : vector<8x8xf32>
    %81 = tpu.matmul %78, %79, %cst_30 {dimension_numbers = #tpu.dot_dimension_numbers<[1], [1], [0], [0], [0, 0, 1, 0], [], []>} : vector<8x8xf32>, vector<8x8xf32>, vector<8x8xf32> -> vector<8x8xf32>
    %cst_31 = arith.constant 5.000000e-01 : f32
    %82 = vector.broadcast %cst_31 : f32 to vector<1x8xf32>
    %83 = arith.cmpf ogt, %3, %82 : vector<1x8xf32>
    %cst_32 = arith.constant -9.99999984E+17 : f32
    %84 = vector.shape_cast %83 : vector<1x8xi1> to vector<1x8xi1>
    %85 = vector.broadcast %84 : vector<1x8xi1> to vector<8x8xi1>
    %86 = vector.broadcast %cst_32 : f32 to vector<8x8xf32>
    %87 = arith.select %85, %86, %81 : vector<8x8xi1>, vector<8x8xf32>
    %cst_33 = arith.constant dense<0xFF800000> : vector<8xf32>
    %88 = vector.multi_reduction <maximumf>, %87, %cst_33 [1] : vector<8x8xf32> to vector<8xf32>
    %89 = vector.shape_cast %88 : vector<8xf32> to vector<8x1xf32>
    %90 = vector.broadcast %89 : vector<8x1xf32> to vector<8x8xf32>
    %91 = arith.subf %87, %90 : vector<8x8xf32>
    %92 = math.exp %91 : vector<8x8xf32>
    %cst_34 = arith.constant dense<0.000000e+00> : vector<8xf32>
    %93 = vector.multi_reduction <add>, %92, %cst_34 [1] : vector<8x8xf32> to vector<8xf32>
    %94 = vector.shape_cast %93 : vector<8xf32> to vector<8x1xf32>
    %cst_35 = arith.constant dense<0.000000e+00> : vector<8x8xf32>
    %95 = tpu.matmul %92, %80, %cst_35 {dimension_numbers = #tpu.dot_dimension_numbers<[1], [0], [0], [1], [0, 0, 1, 1], [], []>} : vector<8x8xf32>, vector<8x8xf32>, vector<8x8xf32> -> vector<8x8xf32>
    %96 = tpu.reciprocal %94 : vector<8x1xf32> -> vector<8x1xf32>
    %97 = vector.broadcast %96 : vector<8x1xf32> to vector<8x8xf32>
    %98 = arith.mulf %95, %97 : vector<8x8xf32>
    %99 = vector.extract_strided_slice %33 {offsets = [0, 24], sizes = [8, 8], strides = [1, 1]} : vector<8x32xf32> to vector<8x8xf32>
    %100 = vector.extract_strided_slice %34 {offsets = [0, 24], sizes = [8, 8], strides = [1, 1]} : vector<8x32xf32> to vector<8x8xf32>
    %101 = vector.extract_strided_slice %35 {offsets = [0, 24], sizes = [8, 8], strides = [1, 1]} : vector<8x32xf32> to vector<8x8xf32>
    %cst_36 = arith.constant dense<0.000000e+00> : vector<8x8xf32>
    %102 = tpu.matmul %99, %100, %cst_36 {dimension_numbers = #tpu.dot_dimension_numbers<[1], [1], [0], [0], [0, 0, 1, 0], [], []>} : vector<8x8xf32>, vector<8x8xf32>, vector<8x8xf32> -> vector<8x8xf32>
    %cst_37 = arith.constant 5.000000e-01 : f32
    %103 = vector.broadcast %cst_37 : f32 to vector<1x8xf32>
    %104 = arith.cmpf ogt, %3, %103 : vector<1x8xf32>
    %cst_38 = arith.constant -9.99999984E+17 : f32
    %105 = vector.shape_cast %104 : vector<1x8xi1> to vector<1x8xi1>
    %106 = vector.broadcast %105 : vector<1x8xi1> to vector<8x8xi1>
    %107 = vector.broadcast %cst_38 : f32 to vector<8x8xf32>
    %108 = arith.select %106, %107, %102 : vector<8x8xi1>, vector<8x8xf32>
    %cst_39 = arith.constant dense<0xFF800000> : vector<8xf32>
    %109 = vector.multi_reduction <maximumf>, %108, %cst_39 [1] : vector<8x8xf32> to vector<8xf32>
    %110 = vector.shape_cast %109 : vector<8xf32> to vector<8x1xf32>
    %111 = vector.broadcast %110 : vector<8x1xf32> to vector<8x8xf32>
    %112 = arith.subf %108, %111 : vector<8x8xf32>
    %113 = math.exp %112 : vector<8x8xf32>
    %cst_40 = arith.constant dense<0.000000e+00> : vector<8xf32>
    %114 = vector.multi_reduction <add>, %113, %cst_40 [1] : vector<8x8xf32> to vector<8xf32>
    %115 = vector.shape_cast %114 : vector<8xf32> to vector<8x1xf32>
    %cst_41 = arith.constant dense<0.000000e+00> : vector<8x8xf32>
    %116 = tpu.matmul %113, %101, %cst_41 {dimension_numbers = #tpu.dot_dimension_numbers<[1], [0], [0], [1], [0, 0, 1, 1], [], []>} : vector<8x8xf32>, vector<8x8xf32>, vector<8x8xf32> -> vector<8x8xf32>
    %117 = tpu.reciprocal %115 : vector<8x1xf32> -> vector<8x1xf32>
    %118 = vector.broadcast %117 : vector<8x1xf32> to vector<8x8xf32>
    %119 = arith.mulf %116, %118 : vector<8x8xf32>
    %120 = tpu.concatenate %56, %77, %98, %119 in 1 : vector<8x8xf32>, vector<8x8xf32>, vector<8x8xf32>, vector<8x8xf32> -> vector<8x32xf32>
    %c0_42 = arith.constant 0 : index
    %c0_43 = arith.constant 0 : index
    %121 = vector.load %arg7[%c0_42, %c0_43] : memref<32x32xf32, #tpu.memory_space<vmem>>, vector<32x32xf32>
    %cst_44 = arith.constant dense<0.000000e+00> : vector<8x32xf32>
    %122 = tpu.matmul %120, %121, %cst_44 {dimension_numbers = #tpu.dot_dimension_numbers<[1], [0], [0], [1], [0, 0, 1, 1], [], []>} : vector<8x32xf32>, vector<32x32xf32>, vector<8x32xf32> -> vector<8x32xf32>
    %c0_45 = arith.constant 0 : index
    %c0_46 = arith.constant 0 : index
    %123 = vector.load %arg8[%c0_45, %c0_46] : memref<1x32xf32, #tpu.memory_space<vmem>>, vector<1x32xf32>
    %124 = vector.broadcast %123 : vector<1x32xf32> to vector<8x32xf32>
    %125 = arith.addf %122, %124 : vector<8x32xf32>
    %126 = arith.addf %125, %1 : vector<8x32xf32>
    %c0_47 = arith.constant 0 : index
    %c0_48 = arith.constant 0 : index
    %c0_49 = arith.constant 0 : index
    %127 = vector.load %arg9[%c0_47, %c0_48, %c0_49] : memref<1x8x32xf32, #tpu.memory_space<vmem>>, vector<1x8x32xf32>
    %128 = vector.shape_cast %127 : vector<1x8x32xf32> to vector<8x32xf32>
    %129 = vector.shape_cast %126 : vector<8x32xf32> to vector<1x8x32xf32>
    tpu.vector_store %arg9[%c0_47, %c0_48, %c0_49], %129 {strides = array<i32>} : memref<1x8x32xf32, #tpu.memory_space<vmem>>, vector<1x8x32xf32>,
    return
  }
  func.func @transform_0(%arg0: i32) -> (i32, i32, i32) {
    %c0_i32 = arith.constant 0 : i32
    %c0_i32_0 = arith.constant 0 : i32
    %c0_i32_1 = arith.constant 0 : i32
    return %arg0, %c0_i32, %c0_i32_0 : i32, i32, i32
  }
  func.func @transform_1(%arg0: i32) -> (i32, i32, i32) {
    %c0_i32 = arith.constant 0 : i32
    %c0_i32_0 = arith.constant 0 : i32
    %c0_i32_1 = arith.constant 0 : i32
    return %arg0, %c0_i32, %c0_i32_0 : i32, i32, i32
  }
  func.func @transform_2(%arg0: i32) -> (i32, i32) {
    %c0_i32 = arith.constant 0 : i32
    %c0_i32_0 = arith.constant 0 : i32
    %c0_i32_1 = arith.constant 0 : i32
    return %c0_i32, %c0_i32_0 : i32, i32
  }
  func.func @transform_3(%arg0: i32) -> (i32, i32) {
    %c0_i32 = arith.constant 0 : i32
    %c0_i32_0 = arith.constant 0 : i32
    %c0_i32_1 = arith.constant 0 : i32
    return %c0_i32, %c0_i32_0 : i32, i32
  }
  func.func @transform_4(%arg0: i32) -> (i32, i32) {
    %c0_i32 = arith.constant 0 : i32
    %c0_i32_0 = arith.constant 0 : i32
    %c0_i32_1 = arith.constant 0 : i32
    return %c0_i32, %c0_i32_0 : i32, i32
  }
  func.func @transform_5(%arg0: i32) -> (i32, i32) {
    %c0_i32 = arith.constant 0 : i32
    %c0_i32_0 = arith.constant 0 : i32
    %c0_i32_1 = arith.constant 0 : i32
    return %c0_i32, %c0_i32_0 : i32, i32
  }
  func.func @transform_6(%arg0: i32) -> (i32, i32) {
    %c0_i32 = arith.constant 0 : i32
    %c0_i32_0 = arith.constant 0 : i32
    %c0_i32_1 = arith.constant 0 : i32
    return %c0_i32, %c0_i32_0 : i32, i32
  }
  func.func @transform_7(%arg0: i32) -> (i32, i32) {
    %c0_i32 = arith.constant 0 : i32
    %c0_i32_0 = arith.constant 0 : i32
    %c0_i32_1 = arith.constant 0 : i32
    return %c0_i32, %c0_i32_0 : i32, i32
  }
  func.func @transform_8(%arg0: i32) -> (i32, i32, i32) {
    %c0_i32 = arith.constant 0 : i32
    %c0_i32_0 = arith.constant 0 : i32
    %c0_i32_1 = arith.constant 0 : i32
    return %arg0, %c0_i32, %c0_i32_0 : i32, i32, i32
  }
}

</mosaic_0001>

<bundles_post_ra>
// kernel: tpu_custom_call.1
= control target key start
LH: loop header
LB: loop body
LE: loop exit
PB: predicated region body
PF: predicated region fallthrough
CT: control target
= control target key end

     0   :  { %13 = vsyncpa [#allocation3], 0  ;;  %s2177_s0 = inlined_call_operand.hbm [shape: f32[2,8,32], index: 0, kind: input, shape index: {}]   ;;  %s2178_s1 = inlined_call_operand.vmem [shape: f32[2,1,8], index: 1, kind: input, shape index: {}]   ;;  %s2179_s2 = inlined_call_operand.vmem [shape: f32[1,32], index: 2, kind: input, shape index: {}]   ;;  %s2180_s3 = inlined_call_operand.vmem [shape: f32[1,32], index: 3, kind: input, shape index: {}]   ;;  %s2181_s4 = inlined_call_operand.hbm [shape: f32[32,96], index: 4, kind: input, shape index: {}]   ;;  %s2182_s5 = inlined_call_operand.vmem [shape: f32[1,96], index: 5, kind: input, shape index: {}]   ;;  %s2183_s6 = inlined_call_operand.hbm [shape: f32[32,32], index: 6, kind: input, shape index: {}]   ;;  %s2184_s7 = inlined_call_operand.vmem [shape: f32[1,32], index: 7, kind: input, shape index: {}]   ;;  %s2185_s8 = inlined_call_operand.hbm [shape: f32[2,8,32], index: 8, kind: output, shape index: {}]  }
   0x1   :  { %15 = vsyncpa [#allocation3 + $0x1], 0 }
   0x2   :  { %16 = vsyncpa [#allocation6], 0 }
   0x3   :  { %17 = vsyncpa [#allocation4], 0 }
   0x4   :  { %19 = vsyncpa [#allocation4 + $0x1], 0  ;;  %s1843_s27 = smov 0   ;;  %s1845_s28 = smov 0  }
   0x5   :  { %s1847_s29 = smov 0   ;;  %s1849_s30 = smov 0  }
   0x6 LB: > { %s1864_s9 = sadd.s32 4294967295, %s1772_s30   ;;  %s1375_s10 = sadd.s32 4294967294, %s1772_s30   ;;  %s1772_s30 = sphi %s1849_s30, %s2205_s30   ;;  %s1768_s29 = sphi %s1847_s29, %s2204_s29   ;;  %s1764_s28 = sphi %s1845_s28, %s2203_s28   ;;  %s1760_s27 = sphi %s1843_s27, %s2202_s27  }
   0x7   : > { %p45_p0 = scmp.ne.s32.totalorder %s1764_s28, %s1760_s27  ;;  %p2186_p1 = scmp.eq.s32.totalorder %s1864_s9, 0 }
   0x8   : > { %p227_p3 = scmp.eq.s32.totalorder %s1375_s10, 1  ;;  %p1376_p5 = scmp.ge.s32.totalorder %s1772_s30, 1 }
   0x9   : > { %p1873_p4 = por %p2186_p1, %p45_p0  ;;  %p234_p7 = scmp.lt.s32.totalorder %s1772_s30, 3 }
   0xa   : > { %p1878_p6 = por %p227_p3, %p45_p0  ;;  %s1774_s14 = smov [#allocation5]  }
   0xb   : > { %s2189_s11 = scalar_select %p1873_p4, 1, 0 }
   0xc   : > { %s2190_s12 = scalar_select %p1878_p6, 1, 0 }
   0xd   : > { %p1883_p8 = pnand %p1376_p5, %p234_p7  ;;  %s252_s15 = sshll.u32 %s1774_s14, 4  ;;  %s1887_s15 = int_to_ptr.vmem [resolvable:$true] %s252_s15 }
   0xe   : > { %s1775_s17 = smov [#allocation7]   ;;  %s1616_s21 = scalar_lea.hbm %s2181_s4, 512 }
   0xf   : > { %p1521_p9 = pneg %p1883_p8  ;;  %s268_s18 = sshll.u32 %s1775_s17, 4  ;;  %s1898_s18 = int_to_ptr.vmem [resolvable:$true] %s268_s18 }
  0x10   : > { %p1617_p12 = scmp.ne.s32.totalorder %s2181_s4, %s1616_s21  ;;  %p1623_p5 = scmp.lt.u32.totalorder %s1616_s21, %s2181_s4 }
  0x11   : > { %p1894_p11 = pnand %p1521_p9, %p2186_p1 }
  0x13   : > { %p1618_p13 = pneg %p1894_p11 }
  0x15   : > { %p1619_p0 = pnand %p1618_p13, %p1617_p12 }
  0x17   : > { %p1620_p3 = pneg %p1619_p0 }
  0x19   : > { %p1625_p7 = pnand %p1623_p5, %p1620_p3 }
  0x1b   : > { %1628 = shalt.err (!%p1625_p7)
}
  0x1c   : > { %s1629_s26 = scalar_lea.vmem %s1887_s15, 512  ;;  %p1637_p2 = scmp.lt.s32.totalorder %s1887_s15, %s1887_s15 }
  0x1d   : > { %p1630_p9 = scmp.ne.s32.totalorder %s1887_s15, %s1629_s26  ;;  %p1638_p12 = scmp.lt.s32.totalorder %s1629_s26, %s1629_s26 }
  0x1f   : > { %p1632_p10 = pnand %p1630_p9, %p1618_p13  ;;  %p1639_p0 = por %p1638_p12, %p1637_p2 }
  0x21   : > { %p1633_p1 = pneg %p1632_p10 }
  0x23   : > { %p1640_p6 = pnand %p1639_p0, %p1633_p1 }
  0x25   : > { %1643 = shalt.err (!%p1640_p6)
}
  0x26   : > { %s1776_s10 = smov 128   ;;  %s1777_s14 = smov 8  }
  0x27   : > { %1524 = dma.hbm_to_vmem [thread:$0]  (!%p1894_p11), %s2181_s4, 512, %s1887_s15, [#allocation6], %s1776_s10, %s1776_s10, %s1777_s14  }
  0x28   : > { %s1644_s22 = scalar_lea.hbm %s2183_s6, 512 }
  0x29   : > { %p1645_p2 = scmp.ne.s32.totalorder %s2183_s6, %s1644_s22  ;;  %p1651_p10 = scmp.lt.u32.totalorder %s1644_s22, %s2183_s6 }
  0x2b   : > { %p1647_p1 = pnand %p1645_p2, %p1618_p13 }
  0x2d   : > { %p1648_p6 = pneg %p1647_p1 }
  0x2f   : > { %p1653_p3 = pnand %p1651_p10, %p1648_p6 }
  0x31   : > { %1656 = shalt.err (!%p1653_p3)
}
  0x32   : > { %s1657_s15 = scalar_lea.vmem %s1898_s18, 512  ;;  %p1665_p12 = scmp.lt.s32.totalorder %s1898_s18, %s1898_s18 }
  0x33   : > { %p1658_p5 = scmp.ne.s32.totalorder %s1898_s18, %s1657_s15  ;;  %p1666_p0 = scmp.lt.s32.totalorder %s1657_s15, %s1657_s15 }
  0x35   : > { %p1660_p7 = pnand %p1658_p5, %p1618_p13  ;;  %p1667_p2 = por %p1666_p0, %p1665_p12 }
  0x37   : > { %p1661_p9 = pneg %p1660_p7 }
  0x39   : > { %p1668_p1 = pnand %p1667_p2, %p1661_p9 }
  0x3b   : > { %1671 = shalt.err (!%p1668_p1)
}
  0x3c   : > { %1527 = dma.hbm_to_vmem [thread:$0]  (!%p1894_p11), %s2183_s6, 512, %s1898_s18, [#allocation6], %s1776_s10, %s1776_s10, %s1777_s14  }
  0x3d   : > { %s1953_s20 = sadd.s32 1, %s1772_s30   ;;  %s32_s16 = sadd.s32 1, %s1768_s29 }
  0x3e   : > { %s29_s21 = ssub.s32 %s1772_s30, %s1953_s20  ;;  %p39_p13 = scmp.ne.s32.totalorder %s1768_s29, %s1764_s28 }
  0x3f   : > { %p30_p6 = scmp.eq.s32.totalorder %s29_s21, 0  ;;  %p40_p10 = scmp.eq.s32.totalorder %s1772_s30, 0 }
  0x40   : > { %p2193_p3 = scmp.eq.s32.totalorder %s1864_s9, 1  ;;  %p1538_p7 = scmp.lt.s32.totalorder %s1772_s30, 2 }
  0x41   : > { %s1969_s23 = scalar_select %p30_p6, %s1768_s29, %s32_s16  }
  0x42   : > { %p1963_p5 = por %p2193_p3, %p39_p13  ;;  %p41_p9 = por %p40_p10, %p39_p13 }
  0x43   : > { %s285_s24 = sand.u32 1, %s1768_s29   ;;  %s1381_s18 = sshll.u32 %s1772_s30, 7 }
  0x44   : > { %s2194_s22 = scalar_select %p1963_p5, 1, 0 }
  0x45   : > { %s1380_s25 = sshll.u32 %s285_s24, 3  ;;  %s1976_s26 = scalar_lea.hbm %s2177_s0, %s1381_s18 }
  0x46   : > { %s289_s15 = scalar_lea.vmem [#allocation2], %s1380_s25  ;;  %p1980_p11 = pnand %p1538_p7, %p41_p9 }
  0x47   : > { %s296_s17 = sshll.u32 %s289_s15, 4  ;;  %s286_s16 = scalar_lea.sflag [#allocation3], %s285_s24  ;;  %s1978_s17 = int_to_ptr.vmem [resolvable:$true] %s296_s17 }
  0x48   : > { %s1672_s21 = scalar_lea.hbm %s1976_s26, 128  ;;  %p1674_p0 = pneg %p1980_p11 }
  0x49   : > { %p1673_p12 = scmp.ne.s32.totalorder %s1976_s26, %s1672_s21  ;;  %s1677_s10 = scalar_lea.hbm %s2177_s0, 256 }
  0x4a   : > { %p1678_p13 = scmp.lt.u32.totalorder %s1976_s26, %s2177_s0  ;;  %p1679_p6 = scmp.lt.u32.totalorder %s1677_s10, %s1672_s21 }
  0x4b   : > { %p1675_p2 = pnand %p1674_p0, %p1673_p12  ;;  %p1681_p3 = scmp.lt.u32.totalorder %s1672_s21, %s1976_s26 }
  0x4c   : > { %p1680_p10 = por %p1679_p6, %p1678_p13 }
  0x4d   : > { %p1676_p1 = pneg %p1675_p2 }
  0x4e   : > { %p1682_p7 = por %p1681_p3, %p1680_p10 }
  0x50   : > { %p1683_p9 = pnand %p1682_p7, %p1676_p1 }
  0x52   : > { %1686 = shalt.err (!%p1683_p9)
}
  0x53   : > { %s1687_s24 = scalar_lea.vmem %s1978_s17, 128  ;;  %s1778_s18 = smov [#allocation2]  }
  0x54   : > { %p1688_p12 = scmp.ne.s32.totalorder %s1978_s17, %s1687_s24  ;;  %s1692_s25 = sshll.u32 %s1778_s18, 4  ;;  %s1693_s25 = int_to_ptr.vmem [resolvable:$false] %s1692_s25 }
  0x55   : > { %s1694_s14 = scalar_lea.vmem %s1693_s25, 256  ;;  %p1695_p4 = scmp.lt.s32.totalorder %s1978_s17, %s1693_s25 }
  0x56   : > { %p1690_p2 = pnand %p1688_p12, %p1674_p0  ;;  %p1696_p13 = scmp.lt.s32.totalorder %s1694_s14, %s1687_s24 }
  0x58   : > { %p1691_p5 = pneg %p1690_p2  ;;  %p1697_p6 = por %p1696_p13, %p1695_p4 }
  0x5a   : > { %p1698_p10 = pnand %p1697_p6, %p1691_p5 }
  0x5c   : > { %1701 = shalt.err (!%p1698_p10)
}
  0x5d   : > { %1531 = dma.hbm_to_vmem [thread:$0]  (!%p1980_p11), %s1976_s26, 128, %s1978_s17, %s286_s16  }
  0x5e   : > { %311 = sbr.rel (%p1883_p8) target bundleno = 2080 (0x820), region = 52  ;;  %s2012_s21 = sand.u32 (!%p1883_p8), 1, %s1764_s28  }
  0x5f   : > { %s1383_s10 = sshll.u32 (!%p1883_p8), %s2012_s21, 3  ;;  %s314_s15 = scalar_lea.sflag (!%p1883_p8), [#allocation3], %s2012_s21 }
  0x60   : > { %s317_s24 = scalar_lea.vmem (!%p1883_p8), [#allocation2], %s1383_s10  ;;  %p2196_p4 = scmp.ne.s32.totalorder (!%p1883_p8), %s2189_s11, 0 }
  0x65   : > { %1747 = dma.done.wait (%p2196_p4), %s314_s15, 128  }
  0x66   : > { %1749 = vsyncadd (%p2196_p4), %s314_s15, 4294967168  ;;  %p2197_p5 = scmp.eq.s32.totalorder %s1864_s9, 0 }
  0x68   : > { %1751 = dma.done.wait (%p2197_p5), [#allocation6], 1024   ;;  %p2198_p8 = pmov %p2197_p5 }
  0x69   : > { %vm368_vm0 = vcmask 261120   ;;  %v2026_v0 = vld [vmem:[%s317_s24] sm:$0xff]  ;;  %v405_v7 = vld [vmem:[#allocation5] sm:$0xff]  ;;  %v406_v8 = vld [vmem:[#allocation5 + $0x8] sm:$0xff]  ;;  %v1779_v10 = vmov 0.0|0.0   ;;  %vm1780_vm1 = vmmov 0   ;;  %v569_v38 = vlaneseq }
  0x6a   : > { %1753 = vsyncadd (%p2198_p8), [#allocation6], 4294966272  ;;  %v369_v1 = vsel %vm368_vm0, %v2026_v0, 0.0  ;;  %v407_v9 = vld [vmem:[#allocation5 + $0x10] sm:$0xff]  ;;  %1497 = vmatprep.subr.bf16.mxu0 %v1779_v10  ;;  %v1498_v11 = vpack.c.bf16 %v406_v8, %v405_v7  ;;  %v408_v12 = vld [vmem:[#allocation5 + $0x18] sm:$0xff]  ;;  %v1781_v13 = vmov 0.0  }
  0x6b   : > { %370 = vadd.xlane.f32.xlu0 %v369_v1  ;;  %1443 = vmatprep.mubr.msk.f32.mxu0 %vm1780_vm1, %v1781_v13  ;;  %v1501_v14 = vpack.c.bf16 %v408_v12, %v407_v9  ;;  %v1387_v24 = vld [vmem:[%s2179_s2] ss:$0 sm:$0xff]  ;;  %s1782_s18 = smov 64   ;;  %s1783_s25 = smov 96   ;;  %vm492_vm4 = vcmask 64512   ;;  %v570_v40 = vshrl.u32 %v569_v38, 7 }
  0x6c   : > { %1446 = vmatprep.subr.mxu1 %v1781_v13  ;;  %1448 = vmatprep.mubr.msk.f32.mxu1 %vm1780_vm1, %v1781_v13  ;;  %v1388_v26 = vld [vmem:[%s2180_s3] ss:$0 sm:$0xff]  ;;  %s1784_s14 = smov 88   ;;  %s1785_s15 = smov 120   ;;  %v1789_v42 = vmov 0   ;;  %vm1173_vm7 = vcmask 130048  }
  0x6d   : > { %1499 = vmatpush3.bf16.msra.mxu0 %v1498_v11  ;;  %v1389_v29 = vld [vmem:[%s2182_s5] ss:$0 sm:$0xff]  ;;  %s1786_s24 = smov 80   ;;  %s1787_s11 = smov 72   ;;  %v571_v41 = vsub.s32 0, %v570_v40  ;;  %vm1175_vm8 = vcmask 195584  }
  0x6e   : > { %1500 = vmatprep.subr.bf16.mxu0 %v1779_v10  ;;  %s1788_s13 = smov 104   ;;  %p361_p11 = scmp.lt.s32.totalorder %s1864_s9, 1 }
  0x6f   : > { %s1406_s19 = sshll.u32 %s1864_s9, 7  ;;  %p2199_p1 = scmp.ne.s32.totalorder %s2194_s22, 0 }
  0x70   : > { %s362_s26 = scalar_select %p361_p11, %s1864_s9, 1 }
  0x71   : > { %1502 = vmatpush3.bf16.msra.mxu0 %v1501_v14  ;;  %s1264_s9 = scalar_lea.sflag [#allocation4], %s2012_s21 }
  0x72   : > { %1466 = vmatprep.subr.mxu0 %v1781_v13  ;;  %s363_s16 = scalar_lea.vmem %s2178_s1, %s362_s26 }
  0x73   : > { %v365_v39 = vld [vmem:[%s363_s16] sm:$0x1]  ;;  %s360_s16 = scalar_lea.vmem [#allocation8], %s1383_s10  ;;  %s1797_s10 = smov [#allocation8]  }
  0x74   : > { %vm567_vm5 = vcmp.gt.f32.partialorder %v365_v39, 0.5 }
  0x75   : > { %v568_v43 = vsel %vm567_vm5, 1, %v1789_v42 }
  0x76   : > { %v572_v44 = vrot.slane %v568_v43, %v571_v41 }
  0x78   : > { %vm573_vm6 = vcmp.eq.s32.totalorder %v572_v44, 1 }
  0xf8   : > { %v371_v2 = vpop.xlane.xlu0 %370 }
  0xf9   : > { %v373_v3 = vmul.f32 0.03125, %v371_v2 }
  0xfb   : > { %v374_v4 = vsub.f32 %v2026_v0, %v373_v3 }
  0xfd   : > { %v375_v5 = vmul.f32 %v374_v4, %v374_v4 }
  0xff   : > { %v376_v6 = vsel %vm368_vm0, %v375_v5, 0.0 }
 0x100   : > { %377 = vadd.xlane.f32.xlu0 %v376_v6 }
 0x18d   : > { %v378_v15 = vpop.xlane.xlu0 %377 }
 0x18e   : > { %v380_v16 = vmul.f32 0.032258064, %v378_v15 }
 0x190   : > { %1596 = vrsqrt.f32 %v380_v16  ;;  %vm383_vm2 = vcmp.eq.f32.partialorder %v380_v16, inf  ;;  %v386_v19 = vand.u32 2147483648, %v380_v16  ;;  %vm385_vm3 = vcmp.eq.f32.partialorder %v380_v16, 0.0 }
 0x19a   : > { %v1597_v17 = vpop.eup %1596 }
 0x19b   : > { %v382_v18 = vmul.f32 %v1597_v17, %v380_v16 }
 0x19d   : > { %v384_v20 = vsel %vm383_vm2, %v380_v16, %v382_v18 }
 0x19e   : > { %v387_v21 = vsel %vm385_vm3, %v386_v19, %v384_v20 }
 0x19f   : > { %v388_v22 = vadd.f32 1e-06, %v387_v21 }
 0x1a1   : > { %1598 = vrcp.f32 %v388_v22 }
 0x1ab   : > { %v1599_v23 = vpop.eup %1598 }
 0x1ac   : > { %v390_v25 = vmul.f32 %v1599_v23, %v374_v4 }
 0x1ae   : > { %v397_v27 = vmul.f32 %v1387_v24, %v390_v25 }
 0x1b0   : > { %v404_v28 = vadd.f32 %v1388_v26, %v397_v27 }
 0x1b2   : > { %1444 = vmatmul.mubr.msk.f32.vlgmr.msra.gmra.mrb[0].mxu0 %vm368_vm0, %v404_v28 }
 0x1b3   : > { %1468 = vmatprep.mubr.msk.f32.mxu0 %vm1780_vm1, %v1781_v13 }
 0x285   : > { %v485_v30 = vpop.f32.mrb[0].mxu0 }
 0x286   : > { %v2052_v31 = vadd.f32 %v1389_v29, %v485_v30  ;;  %v1445_v32 = vpop.f32.mrb[1].mxu0  ;;  %v1177_v30 = vld [vmem:[#allocation7] sm:$0xff] }
 0x288   : > { %584 = vrot.lane.b32.xlu0 %v2052_v31, %s1782_s18  ;;  %490 = vrot.lane.b32.xlu1 %v2052_v31, %s1783_s25  ;;  %s1790_s18 = smov 112   ;;  %s1791_s25 = smov 48  }
 0x28c   : > { %664 = vrot.lane.b32.xlu0 %v2052_v31, %s1784_s14  ;;  %s1792_s14 = smov 56  }
 0x290   : > { %662 = vrot.lane.b32.xlu0 %v2052_v31, %s1785_s15  ;;  %s1793_s15 = smov 40  }
 0x294   : > { %830 = vrot.lane.b32.xlu0 %v2052_v31, %s1786_s24  ;;  %s1794_s24 = smov 8  }
 0x298   : > { %996 = vrot.lane.b32.xlu0 %v2052_v31, %s1787_s11  ;;  %s1795_s11 = smov 16  }
 0x29c   : > { %994 = vrot.lane.b32.xlu0 %v2052_v31, %s1788_s13  ;;  %s1796_s13 = smov 24  }
 0x2fa   : > { %v585_v33 = vpop.permute.xlu0 %584  ;;  %v491_v34 = vpop.permute.xlu1 %490 }
 0x2fb   : > { %1447 = vmatpush3.xpose.msk.msra.mxu1 %vm492_vm4, %v491_v34  ;;  %v1180_v34 = vld [vmem:[#allocation7 + $0x18] sm:$0xff] }
 0x2fc   : > { %1451 = vmatprep.subr.mxu1 %v1781_v13 }
 0x2fe   : > { %v665_v35 = vpop.permute.xlu0 %664  ;;  %1449 = vmatmul.mubr.msk.f32.vlgmr.msra.gmra.mrb[0].mxu1 %vm492_vm4, %v2052_v31 }
 0x2ff   : > { %1452 = vmatpush3.msra.mxu1 %v585_v33  ;;  %1453 = vmatprep.mubr.msk.f32.mxu1 %vm1780_vm1, %v1781_v13  ;;  %v1179_v33 = vld [vmem:[#allocation7 + $0x10] sm:$0xff] }
 0x300   : > { %1456 = vmatprep.subr.mxu1 %v1781_v13 }
 0x302   : > { %v663_v36 = vpop.permute.xlu0 %662 }
 0x306   : > { %v831_v37 = vpop.permute.xlu0 %830 }
 0x307   : > { %1467 = vmatpush3.xpose.msk.msra.mxu0 %vm492_vm4, %v831_v37 }
 0x308   : > { %1476 = vmatprep.subr.mxu0 %v1781_v13 }
 0x30a   : > { %v997_v51 = vpop.permute.xlu0 %996 }
 0x30e   : > { %v995_v54 = vpop.permute.xlu0 %994 }
 0x3d1   : > { %v563_v45 = vpop.f32.mrb[0].mxu1 }
 0x3d2   : > { %v574_v46 = vsel %vm573_vm6, -1e+18, %v563_v45  ;;  %v1450_v47 = vpop.f32.mrb[1].mxu1 }
 0x3d3   : > { %v575_v48 = vsel %vm492_vm4, %v574_v46, -inf }
 0x3d4   : > { %576 = vmax.xlane.f32.xlu1 %v575_v48 }
 0x3e5   : > { %828 = vrot.lane.b32.xlu1 %v2052_v31, %s1790_s18  ;;  %s1277_s18 = sshll.u32 %s360_s16, 4  ;;  %s2134_s18 = int_to_ptr.vmem [resolvable:$true] %s1277_s18 }
 0x461   : > { %v577_v49 = vpop.xlane.xlu1 %576 }
 0x462   : > { %v578_v50 = vsub.f32 %v574_v46, %v577_v49 }
 0x464   : > { %v579_v52 = vmul.f32 1.442695, %v578_v50 }
 0x465   : > { %v829_v53 = vpop.permute.xlu1 %828 }
 0x466   : > { %1600 = vpow2.f32 %v579_v52  ;;  %1469 = vmatmul.mubr.msk.f32.vlgmr.msra.gmra.mrb[2].mxu0 %vm492_vm4, %v829_v53 }
 0x467   : > { %1477 = vmatpush3.xpose.msk.msra.mxu0 %vm492_vm4, %v997_v51  ;;  %1478 = vmatprep.mubr.msk.f32.mxu0 %vm1780_vm1, %v1781_v13 }
 0x468   : > { %1503 = vmatprep.subr.bf16.mxu0 %v1779_v10 }
 0x46a   : > { %1479 = vmatmul.mubr.msk.f32.vlgmr.msra.gmra.mrb[4].mxu0 %vm492_vm4, %v995_v54 }
 0x46b   : > { %1494 = vmatprep.mubr.msk.f32.mxu0 %vm1780_vm1, %v1781_v13 }
 0x470   : > { %v1601_v55 = vpop.eup %1600 }
 0x471   : > { %1454 = vmatmul.mubr.msk.f32.vlgmr.msra.gmra.mrb[2].mxu1 %vm492_vm4, %v1601_v55  ;;  %v581_v23 = vsel %vm492_vm4, %v1601_v55, 0.0 }
 0x472   : > { %1457 = vmatpush3.xpose.msk.msra.mxu1 %vm492_vm4, %v665_v35  ;;  %1458 = vmatprep.mubr.msk.f32.mxu1 %vm1780_vm1, %v1781_v13 }
 0x473   : > { %1461 = vmatprep.subr.mxu1 %v1781_v13 }
 0x475   : > { %1459 = vmatmul.mubr.msk.f32.vlgmr.msra.gmra.mrb[4].mxu1 %vm492_vm4, %v663_v36  ;;  %v1507_v36 = vpack.c.bf16 %v1180_v34, %v1179_v33 }
 0x476   : > { %1463 = vmatprep.mubr.msk.f32.mxu1 %vm1780_vm1, %v1781_v13 }
 0x539   : > { %v902_v56 = vpop.f32.mrb[2].mxu0 }
 0x53a   : > { %v906_v57 = vsel %vm573_vm6, -1e+18, %v902_v56  ;;  %v1470_v58 = vpop.f32.mrb[3].mxu0  ;;  %v1403_v56 = vld [vmem:[%s2184_s7] ss:$0 sm:$0xff] }
 0x53b   : > { %v907_v59 = vsel %vm492_vm4, %v906_v57, -inf }
 0x53c   : > { %908 = vmax.xlane.f32.xlu1 %v907_v59 }
 0x53d   : > { %v1068_v60 = vpop.f32.mrb[4].mxu0 }
 0x53e   : > { %v1072_v61 = vsel %vm573_vm6, -1e+18, %v1068_v60  ;;  %v1480_v62 = vpop.f32.mrb[5].mxu0 }
 0x53f   : > { %v1073_v63 = vsel %vm492_vm4, %v1072_v61, -inf }
 0x540   : > { %1074 = vmax.xlane.f32.xlu0 %v1073_v63 }
 0x544   : > { %v2098_v1 = vpop.f32.mrb[2].mxu1 }
 0x545   : > { %v1455_v2 = vpop.f32.mrb[3].mxu1 }
 0x548   : > { %v736_v3 = vpop.f32.mrb[4].mxu1 }
 0x549   : > { %v740_v4 = vsel %vm573_vm6, -1e+18, %v736_v3  ;;  %v1460_v5 = vpop.f32.mrb[5].mxu1 }
 0x54a   : > { %v741_v6 = vsel %vm492_vm4, %v740_v4, -inf }
 0x54b   : > { %742 = vmax.xlane.f32.xlu0 %v741_v6 }
 0x54d   : > { %916 = vrot.lane.b32.xlu1 %v2052_v31, %s1791_s25 }
 0x561   : > { %750 = vrot.lane.b32.xlu0 %v2052_v31, %s1792_s14 }
 0x565   : > { %1082 = vrot.lane.b32.xlu0 %v2052_v31, %s1793_s15  ;;  %v1178_v31 = vld [vmem:[#allocation7 + $0x8] sm:$0xff]  ;;  %s2132_s15 = scalar_lea.hbm %s2185_s8, %s1406_s19 }
 0x566   : > { %v1504_v32 = vpack.c.bf16 %v1178_v31, %v1177_v30 }
 0x568   : > { %1505 = vmatpush3.bf16.msra.mxu0 %v1504_v32 }
 0x569   : > { %1506 = vmatprep.subr.bf16.mxu0 %v1779_v10 }
 0x56c   : > { %1508 = vmatpush3.bf16.msra.mxu0 %v1507_v36 }
 0x5c9   : > { %v909_v7 = vpop.xlane.xlu1 %908 }
 0x5ca   : > { %v910_v8 = vsub.f32 %v906_v57, %v909_v7 }
 0x5cc   : > { %v911_v9 = vmul.f32 1.442695, %v910_v8 }
 0x5cd   : > { %v1075_v11 = vpop.xlane.xlu0 %1074  ;;  %v917_v25 = vpop.permute.xlu1 %916 }
 0x5ce   : > { %1602 = vpow2.f32 %v911_v9  ;;  %v1076_v12 = vsub.f32 %v1072_v61, %v1075_v11 }
 0x5d0   : > { %v1077_v14 = vmul.f32 1.442695, %v1076_v12 }
 0x5d2   : > { %1604 = vpow2.f32 %v1077_v14 }
 0x5d8   : > { %v1603_v15 = vpop.eup %1602  ;;  %v743_v16 = vpop.xlane.xlu0 %742 }
 0x5d9   : > { %v744_v17 = vsub.f32 %v740_v4, %v743_v16  ;;  %v913_v18 = vsel %vm492_vm4, %v1603_v15, 0.0 }
 0x5da   : > { %914 = vadd.xlane.f32.xlu0 %v913_v18 }
 0x5db   : > { %v745_v19 = vmul.f32 1.442695, %v744_v17 }
 0x5dc   : > { %v1605_v20 = vpop.eup %1604  ;;  %v751_v21 = vpop.permute.xlu0 %750 }
 0x5dd   : > { %1606 = vpow2.f32 %v745_v19  ;;  %1462 = vmatpush3.msra.mxu1 %v751_v21  ;;  %v1079_v22 = vsel %vm492_vm4, %v1605_v20, 0.0 }
 0x5de   : > { %1080 = vadd.xlane.f32.xlu0 %v1079_v22  ;;  %1471 = vmatprep.subr.mxu1 %v1781_v13 }
 0x5e0   : > { %v1083_v27 = vpop.permute.xlu0 %1082 }
 0x5e2   : > { %582 = vadd.xlane.f32.xlu0 %v581_v23 }
 0x5e7   : > { %v1607_v24 = vpop.eup %1606 }
 0x5e8   : > { %1464 = vmatmul.mubr.msk.f32.vlgmr.msra.gmra.mrb[6].mxu1 %vm492_vm4, %v1607_v24  ;;  %v747_v26 = vsel %vm492_vm4, %v1607_v24, 0.0 }
 0x5e9   : > { %1472 = vmatpush3.msra.mxu1 %v917_v25  ;;  %748 = vadd.xlane.f32.xlu1 %v747_v26 }
 0x5ea   : > { %1473 = vmatprep.mubr.msk.f32.mxu1 %vm1780_vm1, %v1781_v13  ;;  %1481 = vmatprep.subr.mxu1 %v1781_v13 }
 0x5ec   : > { %1474 = vmatmul.mubr.msk.f32.vlgmr.msra.gmra.mrb[8].mxu1 %vm492_vm4, %v1603_v15 }
 0x5ed   : > { %1482 = vmatpush3.msra.mxu1 %v1083_v27  ;;  %1483 = vmatprep.mubr.msk.f32.mxu1 %vm1780_vm1, %v1781_v13 }
 0x5f0   : > { %1484 = vmatmul.mubr.msk.f32.vlgmr.msra.gmra.mrb[10].mxu1 %vm492_vm4, %v1605_v20 }
 0x667   : > { %v915_v29 = vpop.xlane.xlu0 %914 }
 0x66b   : > { %v1081_v35 = vpop.xlane.xlu0 %1080 }
 0x66f   : > { %v583_v47 = vpop.xlane.xlu0 %582 }
 0x676   : > { %v749_v28 = vpop.xlane.xlu1 %748 }
 0x677   : > { %1608 = vrcp.f32 %v749_v28 }
 0x678   : > { %1610 = vrcp.f32 %v915_v29 }
 0x679   : > { %1612 = vrcp.f32 %v1081_v35 }
 0x67a   : > { %1614 = vrcp.f32 %v583_v47 }
 0x681   : > { %v1609_v37 = vpop.eup %1608 }
 0x682   : > { %v1611_v40 = vpop.eup %1610 }
 0x683   : > { %v1613_v44 = vpop.eup %1612 }
 0x684   : > { %v1615_v48 = vpop.eup %1614 }
 0x685   : > { %v661_v50 = vmul.f32 %v1615_v48, %v2098_v1 }
 0x6bb   : > { %v822_v13 = vpop.f32.mrb[6].mxu1 }
 0x6bc   : > { %v827_v38 = vmul.f32 %v1609_v37, %v822_v13  ;;  %v1465_v39 = vpop.f32.mrb[7].mxu1 }
 0x6be   : > { %1161 = vrot.lane.b32.xlu1 %v827_v38, %s1794_s24  ;;  %s1702_s24 = scalar_lea.vmem %s2134_s18, 128 }
 0x6bf   : > { %v988_v41 = vpop.f32.mrb[8].mxu1  ;;  %p1703_p0 = scmp.ne.s32.totalorder %s2134_s18, %s1702_s24 }
 0x6c0   : > { %v993_v42 = vmul.f32 %v1611_v40, %v988_v41  ;;  %v1475_v43 = vpop.f32.mrb[9].mxu1 }
 0x6c1   : > { %p1704_p3 = pnand %p1703_p0, %p2199_p1 }
 0x6c2   : > { %1165 = vrot.lane.b32.xlu0 %v993_v42, %s1795_s11  ;;  %s1706_s11 = sshll.u32 %s1797_s10, 4  ;;  %s1707_s11 = int_to_ptr.vmem [resolvable:$false] %s1706_s11 }
 0x6c3   : > { %v1154_v10 = vpop.f32.mrb[10].mxu1  ;;  %p1705_p7 = pneg %p1704_p3  ;;  %p1709_p9 = scmp.lt.s32.totalorder %s2134_s18, %s1707_s11 }
 0x6c4   : > { %v1159_v45 = vmul.f32 %v1613_v44, %v1154_v10  ;;  %v1485_v46 = vpop.f32.mrb[11].mxu1 }
 0x6c6   : > { %1169 = vrot.lane.b32.xlu1 %v1159_v45, %s1796_s13  ;;  %s1708_s13 = scalar_lea.vmem %s1707_s11, 256 }
 0x6c7   : > { %p1710_p12 = scmp.lt.s32.totalorder %s1708_s13, %s1702_s24 }
 0x6c9   : > { %p1711_p2 = por %p1710_p12, %p1709_p9 }
 0x6cb   : > { %p1712_p13 = pnand %p1711_p2, %p1705_p7 }
 0x730   : > { %v1162_v49 = vpop.permute.xlu1 %1161 }
 0x731   : > { %v1172_v52 = vsel %vm492_vm4, %v661_v50, %v1162_v49 }
 0x734   : > { %v1166_v51 = vpop.permute.xlu0 %1165 }
 0x735   : > { %v1174_v53 = vsel %vm1173_vm7, %v1172_v52, %v1166_v51 }
 0x738   : > { %v1170_v54 = vpop.permute.xlu1 %1169 }
 0x739   : > { %v1176_v55 = vsel %vm1175_vm8, %v1174_v53, %v1170_v54 }
 0x73a   : > { %1495 = vmatmul.mubr.msk.f32.vlgmr.msra.gmra.mrb[6].mxu0 %vm368_vm0, %v1176_v55 }
 0x80d   : > { %v1257_v57 = vpop.f32.mrb[6].mxu0 }
 0x80e   : > { %v1258_v58 = vadd.f32 %v1403_v56, %v1257_v57  ;;  %v1496_v59 = vpop.f32.mrb[7].mxu0 }
 0x810   : > { %v1261_v60 = vadd.f32 %v1258_v58, %v2026_v0 }
 0x812   : > { %1262 = vst.msk [vmem:[%s360_s16] sm:$0xff] %vm368_vm0, %v1261_v60 }
 0x813   : > { %1715 = shalt.err (!%p1712_p13)
}
 0x814   : > { %s1716_s21 = scalar_lea.hbm %s2132_s15, 128  ;;  %s1720_s19 = scalar_lea.hbm %s2185_s8, 256 }
 0x815   : > { %p1717_p6 = scmp.ne.s32.totalorder %s2132_s15, %s1716_s21  ;;  %p1721_p5 = scmp.lt.u32.totalorder %s2132_s15, %s2185_s8 }
 0x816   : > { %p1722_p8 = scmp.lt.u32.totalorder %s1720_s19, %s1716_s21  ;;  %p1724_p0 = scmp.lt.u32.totalorder %s1716_s21, %s2132_s15 }
 0x817   : > { %p1718_p10 = pnand %p1717_p6, %p2199_p1 }
 0x818   : > { %p1723_p11 = por %p1722_p8, %p1721_p5 }
 0x819   : > { %p1719_p4 = pneg %p1718_p10 }
 0x81a   : > { %p1725_p3 = por %p1724_p0, %p1723_p11 }
 0x81c   : > { %p1726_p7 = pnand %p1725_p3, %p1719_p4 }
 0x81e   : > { %1729 = shalt.err (!%p1726_p7)
}
 0x81f   : > { %1519 = dma.vmem_to_hbm [thread:$0]  (%p2199_p1), %s2134_s18, 128, %s2132_s15, %s1264_s9  }
 0x820 PF: > { %s1289_s14 = sand.u32 1, %s1760_s27   ;;  %p2200_p9 = scmp.ne.s32.totalorder %s2190_s12, 0 }
 0x821   : > { %p2201_p12 = scmp.ge.s32.totalorder %s1772_s30, 2  ;;  %s1290_s24 = scalar_lea.sflag [#allocation4], %s1289_s14 }
 0x823   : > { %p1533_p2 = pnand %p2201_p12, %p2200_p9 }
 0x825   : > { %1755 = dma.done.wait (!%p1533_p2), %s1290_s24, 128  }
 0x826   : > { %1757 = vsyncadd (!%p1533_p2), %s1290_s24, 4294967168  ;;  %p22_p13 = scmp.ge.s32.totalorder %s1953_s20, 4   ;;  %s2202_s27 = smov %s1764_s28 }
 0x827   : > { %s2203_s28 = smov %s1768_s29  ;;  %s2204_s29 = smov %s1969_s23 }
 0x828   : > { %s2205_s30 = smov %s1953_s20  ;;  %24 = sbr.rel (!%p22_p13) target bundleno = 6 (0x6), region = 108 }
 0x82f   :  { %1295 = vsyncpa [#allocation3], 1 }
 0x830   :  { %1297 = vsyncpa [#allocation3 + $0x1], 1 }
 0x831   :  { %1298 = vsyncpa [#allocation6], 1 }
 0x832   :  { %1299 = vsyncpa [#allocation4], 1 }
 0x833   :  { %1301 = vsyncpa [#allocation4 + $0x1], 1 }

</bundles_post_ra>
